<compile_context>
chip_gen: v7x
topology: tpu7x:2x2x1
jax: 0.10.0
libtpu: 0.0.40
codegen_flags: <defaults>
</compile_context>

<pallas_src>
import functools

import numpy as np
import jax
import jax.numpy as jnp
from jax import lax
from jax.experimental import pallas as pl
from jax.experimental.pallas import tpu as pltpu

N, C, H, W = 2, 2, 16, 16          # small shapes consistent with the module (C must be 2)
KSIZE = 5
PAD = KSIZE // 2
NC = N * C
HW = H * W
TOTAL = N * C * H * W


# ---------------------------------------------------------------------------
# Deterministic constants (host-side glue, only needed when compute_lb=True)
# ---------------------------------------------------------------------------
def _get_sobel_kernels(size=KSIZE):
    # Matches hover-net get_sobel_kernel (torch.meshgrid, indexing='ij').
    rng = np.arange(-(size // 2), size // 2 + 1, dtype=np.float32)   # [-2..2]
    h = rng[:, None] * np.ones((1, size), np.float32)                # h[i, j] = rng[i]
    v = np.ones((size, 1), np.float32) * rng[None, :]                # v[i, j] = rng[j]
    kernel_h = h / (h * h + v * v + 1.0e-15)
    kernel_v = v / (h * h + v * v + 1.0e-15)
    return kernel_h, kernel_v


def _build_flat_conv_matrix(kernel, height, width):
    """(H*W, H*W) matrix M such that conv2d(img, kernel, 'same') == img_flat @ M."""
    M = np.zeros((height * width, height * width), np.float32)
    for i in range(height):
        for j in range(width):
            p = i * width + j
            for a in range(KSIZE):
                for b in range(KSIZE):
                    ii = i + a - PAD
                    jj = j + b - PAD
                    if 0 <= ii < height and 0 <= jj < width:
                        M[ii * width + jj, p] += kernel[a, b]
    return M


@functools.lru_cache(maxsize=None)
def _get_fused_conv_const(height, width):
    """Single bf16 (H*W, 2*H*W) constant [kh | kv]; built & uploaded once."""
    kernel_h, kernel_v = _get_sobel_kernels()
    kh = _build_flat_conv_matrix(kernel_h, height, width)
    kv = _build_flat_conv_matrix(kernel_v, height, width)
    khv = np.concatenate([kh, kv], axis=1)                           # (HW, 2*HW)
    return jnp.asarray(khv, dtype=jnp.bfloat16)


# ---------------------------------------------------------------------------
# Pallas kernels
# ---------------------------------------------------------------------------
def _la_kernel(x_ref, t_ref, out_ref):
    # x_ref/t_ref: (8, TOTAL//8) f32 -> exactly one vreg at (2,2,16,16).
    d = jnp.tanh(x_ref[...]) - t_ref[...]
    out_ref[0, 0] = jnp.sum(d * d) * jnp.float32(10.0 / TOTAL)


def _hv_loss_full_kernel(x_ref, t_ref, khv_ref, out_ref):
    # x_ref/t_ref: (C*N, HW) f32, channel-major rows: [h-channel rows; v-channel rows].
    # khv_ref: (HW, 2*HW) bf16 fused flattened-conv matrices [kh | kv].
    d = jnp.tanh(x_ref[...]) - t_ref[...]                            # (C*N, HW) f32
    la = jnp.sum(d * d) * jnp.float32(10.0 / TOTAL)                  # 10/TOTAL folded

    # Conv is linear, so sobel(x) - sobel(t) == sobel(d): a single bf16 MXU
    # matmul against the fused [kh | kv] RHS gives both gradients.
    g = jnp.dot(d.astype(jnp.bfloat16), khv_ref[...],
                preferred_element_type=jnp.float32)                  # (C*N, 2*HW)
    gh = g[:N, :HW]          # horizontal sobel on the horizontal-channel rows
    gv = g[N:, HW:]          # vertical sobel on the vertical-channel rows
    lb = (jnp.sum(gh * gh) + jnp.sum(gv * gv)) * jnp.float32(1.0 / (N * H * W))

    # Keep the 0 * Lb term for exact NaN/Inf propagation parity.
    out_ref[0, 0] = la + jnp.float32(0.0) * lb


# ---------------------------------------------------------------------------
# Wrapper
# ---------------------------------------------------------------------------
def hv_branch_loss(hv_logits, hv_targets, compute_lb=False):
    """loss = 10*La + 0*Lb.

    compute_lb=False (default, fast): skips the zero-weighted Lb term entirely.
    compute_lb=True: keeps Lb (NaN/Inf parity with the reference) via one fused
    flattened-conv bf16 MXU matmul on d = tanh(x) - t.
    """
    x = hv_logits.astype(jnp.float32)
    t = hv_targets.astype(jnp.float32)

    if not compute_lb:
        xf = x.reshape(8, TOTAL // 8)                                # lane-dense: 1 vreg
        tf = t.reshape(8, TOTAL // 8)
        out = pl.pallas_call(
            _la_kernel,
            out_shape=jax.ShapeDtypeStruct((1, 1), jnp.float32),
            in_specs=[pl.BlockSpec(memory_space=pltpu.MemorySpace.VMEM)] * 2,
            out_specs=pl.BlockSpec(memory_space=pltpu.MemorySpace.SMEM),
        )(xf, tf)
        return out[0, 0]

    khv = _get_fused_conv_const(H, W)                                # (256, 512) bf16
    # Channel-major layout so per-channel gradient selection in-kernel is two
    # contiguous slices (no iota masks): rows = [c0n0..c0n{N-1}, c1n0..c1n{N-1}].
    xf = jnp.transpose(x, (1, 0, 2, 3)).reshape(C * N, HW)
    tf = jnp.transpose(t, (1, 0, 2, 3)).reshape(C * N, HW)
    out = pl.pallas_call(
        _hv_loss_full_kernel,
        out_shape=jax.ShapeDtypeStruct((1, 1), jnp.float32),
        in_specs=[pl.BlockSpec(memory_space=pltpu.MemorySpace.VMEM)] * 3,
        out_specs=pl.BlockSpec(memory_space=pltpu.MemorySpace.SMEM),
    )(xf, tf, khv)
    return out[0, 0]


# ---------------------------------------------------------------------------
# Pure-JAX reference (for correctness check)
# ---------------------------------------------------------------------------
def _ref_loss(hv_logits, hv_targets):
    x = jnp.tanh(hv_logits.astype(jnp.float32))
    t = hv_targets.astype(jnp.float32)
    la = jnp.mean((x - t) ** 2)

    kernel_h, kernel_v = _get_sobel_kernels()
    kh = jnp.asarray(kernel_h).reshape(1, 1, KSIZE, KSIZE)
    kv = jnp.asarray(kernel_v).reshape(1, 1, KSIZE, KSIZE)

    def conv(img, k):
        return lax.conv_general_dilated(
            img, k, (1, 1), [(PAD, PAD), (PAD, PAD)],
            dimension_numbers=("NCHW", "OIHW", "NCHW"))

    gh = conv(x[:, 0:1], kh)[:, 0]
    gv = conv(x[:, 1:2], kv)[:, 0]
    gth = conv(t[:, 0:1], kh)[:, 0]
    gtv = conv(t[:, 1:2], kv)[:, 0]
    lb = jnp.mean((gh - gth) ** 2) + jnp.mean((gv - gtv) ** 2)
    return 10.0 * la + 0.0 * lb


if __name__ == "__main__":
    key = jax.random.PRNGKey(0)
    k1, k2 = jax.random.split(key)
    hv_logits = jax.random.normal(k1, (N, C, H, W), dtype=jnp.float32)
    hv_targets = jnp.tanh(jax.random.normal(k2, (N, C, H, W), dtype=jnp.float32))

    ref = _ref_loss(hv_logits, hv_targets)

    # Fast path (default): La only (Lb has zero weight).
    loss_fast = hv_branch_loss(hv_logits, hv_targets)
    jax.block_until_ready(loss_fast)
    assert np.allclose(np.asarray(loss_fast), np.asarray(ref), rtol=1e-4, atol=1e-5), (
        loss_fast, ref)

    # Gated path: Lb kept via one fused bf16 flattened-conv MXU matmul.
    loss_full = hv_branch_loss(hv_logits, hv_targets, compute_lb=True)
    jax.block_until_ready(loss_full)
    assert np.allclose(np.asarray(loss_full), np.asarray(ref), rtol=1e-4, atol=1e-5), (
        loss_full, ref)

    print("KERNEL_OK")
</pallas_src>

<mosaic_0001>
module attributes {stable_mosaic.version = 11 : i64} {
  func.func @_la_kernel(%arg0: memref<8x128xf32, #tpu.memory_space<vmem>>, %arg1: memref<8x128xf32, #tpu.memory_space<vmem>>, %arg2: memref<1x1xf32, #tpu.memory_space<smem>>) attributes {dimension_semantics = [], scalar_prefetch = 0 : i64, scratch_operands = 0 : i64, tpu.core_type = #tpu.core_type<tc>} {
    %c0 = arith.constant 0 : index
    %c0_0 = arith.constant 0 : index
    %0 = vector.load %arg0[%c0, %c0_0] : memref<8x128xf32, #tpu.memory_space<vmem>>, vector<8x128xf32>
    %1 = math.tanh %0 : vector<8x128xf32>
    %c0_1 = arith.constant 0 : index
    %c0_2 = arith.constant 0 : index
    %2 = vector.load %arg1[%c0_1, %c0_2] : memref<8x128xf32, #tpu.memory_space<vmem>>, vector<8x128xf32>
    %3 = arith.subf %1, %2 : vector<8x128xf32>
    %4 = arith.mulf %3, %3 : vector<8x128xf32>
    %5 = vector.shape_cast %4 : vector<8x128xf32> to vector<1x8x128xf32>
    %cst = arith.constant dense<0.000000e+00> : vector<1xf32>
    %6 = vector.multi_reduction <add>, %5, %cst [1, 2] : vector<1x8x128xf32> to vector<1xf32>
    %7 = vector.shape_cast %6 : vector<1xf32> to vector<1x1x1xf32>
    %8 = vector.extract %7[0, 0, 0] : f32 from vector<1x1x1xf32>
    %cst_3 = arith.constant 0.009765625 : f32
    %9 = arith.mulf %8, %cst_3 : f32
    %c0_4 = arith.constant 0 : index
    %c0_5 = arith.constant 0 : index
    %10 = memref.load %arg2[%c0_4, %c0_5] : memref<1x1xf32, #tpu.memory_space<smem>>
    memref.store %9, %arg2[%c0_4, %c0_5] : memref<1x1xf32, #tpu.memory_space<smem>>
    return
  }
}

</mosaic_0001>

<bundles_post_ra>
// kernel: tpu_custom_call.1
= control target key start
LH: loop header
LB: loop body
LE: loop exit
PB: predicated region body
PF: predicated region fallthrough
CT: control target
= control target key end

     0   :  { %7 = vsyncpa [#allocation3], 0  ;;  %s189_s0 = inlined_call_operand.hbm [shape: f32[8,128], index: 0, kind: input, shape index: {}]   ;;  %s190_s1 = inlined_call_operand.hbm [shape: f32[8,128], index: 1, kind: input, shape index: {}]   ;;  %s191_s2 = inlined_call_operand.hbm [shape: f32[1,1], index: 2, kind: output, shape index: {}]  }
   0x1   :  { %8 = vsyncpa [#allocation6], 0 }
   0x2   :  { %9 = vsyncpa [#allocation4], 0  ;;  %s135_s9 = smov [#allocation2]   ;;  %s136_s11 = smov [#allocation5]  }
   0x3   :  { %s16_s10 = sshll.u32 %s135_s9, 4  ;;  %s26_s12 = sshll.u32 %s136_s11, 4  ;;  %s17_s10 = int_to_ptr.vmem [resolvable:$true] %s16_s10  ;;  %s27_s12 = int_to_ptr.vmem [resolvable:$true] %s26_s12 }
   0x4   :  { %s75_s15 = scalar_lea.hbm %s189_s0, 128 }
   0x5   :  { %p76_p0 = scmp.ne.s32.totalorder %s189_s0, %s75_s15  ;;  %p79_p1 = scmp.lt.u32.totalorder %s75_s15, %s189_s0 }
   0x7   :  { %p81_p2 = pnand %p79_p1, %p76_p0 }
   0x9   :  { %84 = shalt.err (!%p81_p2)
}
   0xa   :  { %s85_s20 = scalar_lea.vmem %s17_s10, 128  ;;  %p90_p4 = scmp.lt.s32.totalorder %s17_s10, %s17_s10 }
   0xb   :  { %p86_p3 = scmp.ne.s32.totalorder %s17_s10, %s85_s20  ;;  %p91_p5 = scmp.lt.s32.totalorder %s85_s20, %s85_s20 }
   0xd   :  { %p92_p6 = por %p91_p5, %p90_p4 }
   0xf   :  { %p93_p7 = pnand %p92_p6, %p86_p3 }
  0x11   :  { %96 = shalt.err (!%p93_p7)
}
  0x12   :  { %19 = dma.hbm_to_vmem [thread:$0]  %s189_s0, 128, %s17_s10, [#allocation3]  }
  0x13   :  { %s97_s25 = scalar_lea.hbm %s190_s1, 128 }
  0x14   :  { %p98_p8 = scmp.ne.s32.totalorder %s190_s1, %s97_s25  ;;  %p101_p9 = scmp.lt.u32.totalorder %s97_s25, %s190_s1 }
  0x16   :  { %p103_p10 = pnand %p101_p9, %p98_p8 }
  0x18   :  { %106 = shalt.err (!%p103_p10)
}
  0x19   :  { %s107_s30 = scalar_lea.vmem %s27_s12, 128  ;;  %p112_p12 = scmp.lt.s32.totalorder %s27_s12, %s27_s12 }
  0x1a   :  { %p108_p11 = scmp.ne.s32.totalorder %s27_s12, %s107_s30  ;;  %p113_p13 = scmp.lt.s32.totalorder %s107_s30, %s107_s30 }
  0x1c   :  { %p114_p0 = por %p113_p13, %p112_p12 }
  0x1e   :  { %p115_p1 = pnand %p114_p0, %p108_p11 }
  0x20   :  { %118 = shalt.err (!%p115_p1)
}
  0x21   :  { %29 = dma.hbm_to_vmem [thread:$0]  %s190_s1, 128, %s27_s12, [#allocation6]  }
  0x22   :  { %129 = dma.done.wait [#allocation3], 128  }
  0x23   :  { %130 = vsyncadd [#allocation3], 4294967168 }
  0x24   :  { %131 = dma.done.wait [#allocation6], 128  }
  0x25   :  { %132 = vsyncadd [#allocation6], 4294967168  ;;  %v36_v0 = vld [vmem:[#allocation2] sm:$0xff]  ;;  %v38_v1 = vld [vmem:[#allocation5] sm:$0xff]  ;;  %s119_s7 = scalar_lea.hbm %s191_s2, 16 }
  0x26   :  { %73 = vtanh.f32 %v36_v0  ;;  %p120_p2 = scmp.ne.s32.totalorder %s191_s2, %s119_s7  ;;  %p123_p3 = scmp.lt.u32.totalorder %s119_s7, %s191_s2 }
  0x28   :  { %p125_p4 = pnand %p123_p3, %p120_p2 }
  0x30   :  { %v74_v2 = vpop.eup %73 }
  0x31   :  { %v39_v3 = vsub.f32 %v74_v2, %v38_v1 }
  0x33   :  { %v40_v4 = vmul.f32 %v39_v3, %v39_v3 }
  0x35   :  { %41 = vadd.xlane.f32.xlu0 %v40_v4 }
  0xc2   :  { %v42_v5 = vpop.xlane.xlu0 %41 }
  0xc3   :  { %v43_v6 = vrot.slane %v42_v5, 4 }
  0xc5   :  { %v44_v7 = vadd.f32 %v43_v6, %v42_v5 }
  0xc7   :  { %v45_v8 = vrot.slane %v44_v7, 2 }
  0xc9   :  { %v46_v9 = vadd.f32 %v45_v8, %v44_v7 }
  0xcb   :  { %v47_v10 = vrot.slane %v46_v9, 1 }
  0xcd   :  { %v48_v11 = vadd.f32 %v47_v10, %v46_v9 }
  0xcf   :  { %68 = vpush %v48_v11 }
 0x100   :  { %s69_s1 = spop %68 }
 0x101   :  { %s50_s4 = smul.f32 0.009765625, %s69_s1 }
 0x103   :  { %52 = sst [smem:[#allocation7]] %s50_s4 }
 0x104   :  { %128 = shalt.err (!%p125_p4)
}
 0x105   :  { %s137_s12 = smov [#allocation7]  }
 0x106   :  { %60 = dma.smem_to_hbm %s137_s12, 16, %s191_s2, [#allocation4]  }
 0x107   :  { %133 = dma.done.wait [#allocation4], 16  }
 0x108   :  { %134 = vsyncadd [#allocation4], 4294967280 }
 0x109   :  { %64 = sfence }
 0x10a   :  { %65 = vsyncpa [#allocation3], 1 }
 0x10b   :  { %66 = vsyncpa [#allocation6], 1 }
 0x10c   :  { %67 = vsyncpa [#allocation4], 1 }

</bundles_post_ra>
